<compile_context>
chip_gen: v7x
topology: tpu7x:2x2x1
jax: 0.10.0
libtpu: 0.0.40
codegen_flags: <defaults>
</compile_context>

<pallas_src>
import functools

import numpy as np
import jax
import jax.numpy as jnp
from jax import lax
from jax.experimental import pallas as pl
from jax.experimental.pallas import tpu as pltpu

EPS = 1e-3
GAUSS_K = np.array([0.05, 0.25, 0.4, 0.25, 0.05], dtype=np.float32)


def _replicate_conv_matrix(n: int) -> np.ndarray:
    """A[h, h'] s.t. (A @ v)[h] = sum_i k[i] * v[clamp(h + i - 2, 0, n-1)]."""
    A = np.zeros((n, n), dtype=np.float32)
    for h in range(n):
        for i, kv in enumerate(GAUSS_K):
            hp = min(max(h + i - 2, 0), n - 1)
            A[h, hp] += kv
    return A


@functools.lru_cache(maxsize=None)
def _fused_conv_matrices(H: int, W: int):
    """B_h = 4 * A_h @ diag(even_h) @ A_h,  B_w^T = A_w^T @ diag(even_w) @ A_w^T."""
    Ah = _replicate_conv_matrix(H)
    Aw = _replicate_conv_matrix(W)
    eh = np.zeros((H,), dtype=np.float32)
    eh[::2] = 1.0
    ew = np.zeros((W,), dtype=np.float32)
    ew[::2] = 1.0
    Bh = 4.0 * ((Ah * eh[None, :]) @ Ah)          # (H, H)
    BwT = (Aw.T * ew[None, :]) @ Aw.T             # (W, W)
    return np.asarray(Bh, np.float32), np.asarray(BwT, np.float32)


def _edge_loss_kernel(x_ref, y_ref, bh_ref, bwt_ref, out_ref):
    # x_ref / y_ref : (1, H, W) f32 plane blocks
    # bh_ref        : (H, H) fused row operator (resident across the grid)
    # bwt_ref       : (W, W) fused transposed col operator (resident)
    # out_ref       : (1, 8, 128) per-plane partial Charbonnier sum (broadcast)
    d = x_ref[0] - y_ref[0]                                      # laplacian is linear
    t = jnp.dot(bh_ref[...], d, preferred_element_type=jnp.float32)
    lap = d - jnp.dot(t, bwt_ref[...], preferred_element_type=jnp.float32)
    s = jnp.sum(jnp.sqrt(lap * lap + jnp.float32(EPS * EPS)))
    out_ref[...] = jnp.broadcast_to(s, out_ref.shape)


@jax.jit
def edge_loss(x, y):
    """x, y: (B, C, H, W) float32 with C == 3 (as implied by the PyTorch module)."""
    B, C, H, W = x.shape
    assert C == 3, "EdgeLoss kernel is built for 3-channel inputs"
    BC = B * C
    x3 = x.reshape(BC, H, W).astype(jnp.float32)
    y3 = y.reshape(BC, H, W).astype(jnp.float32)
    bh_np, bwt_np = _fused_conv_matrices(H, W)
    bh = jnp.asarray(bh_np)     # (H, H)
    bwt = jnp.asarray(bwt_np)   # (W, W)

    # Scoped-VMEM sizing: 2 inputs x 2 pipeline buffers x one (H, W) f32 plane
    # + the resident fused conv matrices + output blocks.  Only raise the limit
    # when the default (16/32 MiB) would not cover it; keep v7x headroom.
    plane_bytes = H * W * 4
    vmem_need = 2 * 2 * plane_bytes + (H * H + W * W) * 4 + 2 * 8 * 128 * 4
    cp_kwargs = dict(dimension_semantics=("parallel",))
    if vmem_need > 12 * (1 << 20):
        cp_kwargs["vmem_limit_bytes"] = min(int(vmem_need * 1.5) + (2 << 20),
                                            56 * (1 << 20))

    partial = pl.pallas_call(
        _edge_loss_kernel,
        out_shape=jax.ShapeDtypeStruct((BC, 8, 128), jnp.float32),
        grid=(BC,),
        in_specs=[
            pl.BlockSpec((1, H, W), lambda b: (b, 0, 0)),
            pl.BlockSpec((1, H, W), lambda b: (b, 0, 0)),
            pl.BlockSpec((H, H), lambda b: (0, 0)),   # constant index map => resident
            pl.BlockSpec((W, W), lambda b: (0, 0)),   # constant index map => resident
        ],
        out_specs=pl.BlockSpec((1, 8, 128), lambda b: (b, 0, 0)),
        compiler_params=pltpu.CompilerParams(**cp_kwargs),
    )(x3, y3, bh, bwt)

    return jnp.sum(partial[:, 0, 0]) / jnp.float32(BC * H * W)


# ---------------- pure-JAX reference (mirrors the PyTorch module) ----------------
def _ref_conv_gauss(img):
    k2 = np.outer(GAUSS_K, GAUSS_K).astype(np.float32)
    kern = jnp.asarray(np.tile(k2[None, None], (3, 1, 1, 1)))  # (3,1,5,5) OIHW
    p = jnp.pad(img, ((0, 0), (0, 0), (2, 2), (2, 2)), mode="edge")
    return lax.conv_general_dilated(
        p, kern, window_strides=(1, 1), padding="VALID",
        feature_group_count=3,
        dimension_numbers=("NCHW", "OIHW", "NCHW"))


def _ref_laplacian(img):
    f = _ref_conv_gauss(img)
    nf = jnp.zeros_like(f).at[:, :, ::2, ::2].set(f[:, :, ::2, ::2] * 4.0)
    return img - _ref_conv_gauss(nf)


def _ref_edge_loss(x, y):
    d = _ref_laplacian(x) - _ref_laplacian(y)
    return jnp.mean(jnp.sqrt(d * d + EPS * EPS))


if __name__ == "__main__":
    key = jax.random.PRNGKey(0)
    kx, ky = jax.random.split(key)
    x = jax.random.uniform(kx, (2, 3, 16, 16), dtype=jnp.float32)
    y = jax.random.uniform(ky, (2, 3, 16, 16), dtype=jnp.float32)

    loss = jax.block_until_ready(edge_loss(x, y))
    ref = jax.block_until_ready(_ref_edge_loss(x, y))
    assert np.allclose(np.asarray(loss), np.asarray(ref), rtol=1e-5, atol=1e-5), (
        float(loss), float(ref))
    print("KERNEL_OK")
</pallas_src>

<mosaic_0001>
module attributes {stable_mosaic.version = 11 : i64} {
  func.func @_edge_loss_kernel(%arg0: i32, %arg1: memref<1x16x16xf32, #tpu.memory_space<vmem>>, %arg2: memref<1x16x16xf32, #tpu.memory_space<vmem>>, %arg3: memref<16x16xf32, #tpu.memory_space<vmem>>, %arg4: memref<16x16xf32, #tpu.memory_space<vmem>>, %arg5: memref<1x8x128xf32, #tpu.memory_space<vmem>>) attributes {dimension_semantics = [#tpu.dimension_semantics<parallel>], iteration_bounds = array<i64: 6>, scalar_prefetch = 0 : i64, scratch_operands = 0 : i64, tpu.core_type = #tpu.core_type<tc>, window_params = [{transform_indices = @transform_0, window_bounds = array<i64: 1, 16, 16>}, {transform_indices = @transform_1, window_bounds = array<i64: 1, 16, 16>}, {pipeline_mode = #tpu.pipeline_mode<synchronous>, transform_indices = @transform_2, window_bounds = array<i64: 16, 16>}, {pipeline_mode = #tpu.pipeline_mode<synchronous>, transform_indices = @transform_3, window_bounds = array<i64: 16, 16>}, {transform_indices = @transform_4, window_bounds = array<i64: 1, 8, 128>}]} {
    %c0 = arith.constant 0 : index
    %c0_0 = arith.constant 0 : index
    %c0_1 = arith.constant 0 : index
    %0 = vector.load %arg1[%c0, %c0_0, %c0_1] : memref<1x16x16xf32, #tpu.memory_space<vmem>>, vector<1x16x16xf32>
    %1 = vector.shape_cast %0 : vector<1x16x16xf32> to vector<16x16xf32>
    %c0_2 = arith.constant 0 : index
    %c0_3 = arith.constant 0 : index
    %c0_4 = arith.constant 0 : index
    %2 = vector.load %arg2[%c0_2, %c0_3, %c0_4] : memref<1x16x16xf32, #tpu.memory_space<vmem>>, vector<1x16x16xf32>
    %3 = vector.shape_cast %2 : vector<1x16x16xf32> to vector<16x16xf32>
    %4 = arith.subf %1, %3 : vector<16x16xf32>
    %c0_5 = arith.constant 0 : index
    %c0_6 = arith.constant 0 : index
    %5 = vector.load %arg3[%c0_5, %c0_6] : memref<16x16xf32, #tpu.memory_space<vmem>>, vector<16x16xf32>
    %cst = arith.constant dense<0.000000e+00> : vector<16x16xf32>
    %6 = tpu.matmul %5, %4, %cst {dimension_numbers = #tpu.dot_dimension_numbers<[1], [0], [0], [1], [0, 0, 1, 1], [], []>} : vector<16x16xf32>, vector<16x16xf32>, vector<16x16xf32> -> vector<16x16xf32>
    %c0_7 = arith.constant 0 : index
    %c0_8 = arith.constant 0 : index
    %7 = vector.load %arg4[%c0_7, %c0_8] : memref<16x16xf32, #tpu.memory_space<vmem>>, vector<16x16xf32>
    %cst_9 = arith.constant dense<0.000000e+00> : vector<16x16xf32>
    %8 = tpu.matmul %6, %7, %cst_9 {dimension_numbers = #tpu.dot_dimension_numbers<[1], [0], [0], [1], [0, 0, 1, 1], [], []>} : vector<16x16xf32>, vector<16x16xf32>, vector<16x16xf32> -> vector<16x16xf32>
    %9 = arith.subf %4, %8 : vector<16x16xf32>
    %10 = arith.mulf %9, %9 : vector<16x16xf32>
    %cst_10 = arith.constant 9.99999997E-7 : f32
    %11 = vector.broadcast %cst_10 : f32 to vector<16x16xf32>
    %12 = arith.addf %10, %11 : vector<16x16xf32>
    %13 = math.sqrt %12 : vector<16x16xf32>
    %14 = vector.shape_cast %13 : vector<16x16xf32> to vector<1x16x16xf32>
    %cst_11 = arith.constant dense<0.000000e+00> : vector<1xf32>
    %15 = vector.multi_reduction <add>, %14, %cst_11 [1, 2] : vector<1x16x16xf32> to vector<1xf32>
    %16 = vector.shape_cast %15 : vector<1xf32> to vector<1x1x1xf32>
    %17 = vector.extract %16[0, 0, 0] : f32 from vector<1x1x1xf32>
    %18 = vector.broadcast %17 : f32 to vector<1x8x128xf32>
    %c0_12 = arith.constant 0 : index
    %c0_13 = arith.constant 0 : index
    %c0_14 = arith.constant 0 : index
    %19 = vector.load %arg5[%c0_12, %c0_13, %c0_14] : memref<1x8x128xf32, #tpu.memory_space<vmem>>, vector<1x8x128xf32>
    tpu.vector_store %arg5[%c0_12, %c0_13, %c0_14], %18 {strides = array<i32>} : memref<1x8x128xf32, #tpu.memory_space<vmem>>, vector<1x8x128xf32>,
    return
  }
  func.func @transform_0(%arg0: i32) -> (i32, i32, i32) {
    %c0_i32 = arith.constant 0 : i32
    %c0_i32_0 = arith.constant 0 : i32
    %c0_i32_1 = arith.constant 0 : i32
    return %arg0, %c0_i32, %c0_i32_0 : i32, i32, i32
  }
  func.func @transform_1(%arg0: i32) -> (i32, i32, i32) {
    %c0_i32 = arith.constant 0 : i32
    %c0_i32_0 = arith.constant 0 : i32
    %c0_i32_1 = arith.constant 0 : i32
    return %arg0, %c0_i32, %c0_i32_0 : i32, i32, i32
  }
  func.func @transform_2(%arg0: i32) -> (i32, i32) {
    %c0_i32 = arith.constant 0 : i32
    %c0_i32_0 = arith.constant 0 : i32
    %c0_i32_1 = arith.constant 0 : i32
    return %c0_i32, %c0_i32_0 : i32, i32
  }
  func.func @transform_3(%arg0: i32) -> (i32, i32) {
    %c0_i32 = arith.constant 0 : i32
    %c0_i32_0 = arith.constant 0 : i32
    %c0_i32_1 = arith.constant 0 : i32
    return %c0_i32, %c0_i32_0 : i32, i32
  }
  func.func @transform_4(%arg0: i32) -> (i32, i32, i32) {
    %c0_i32 = arith.constant 0 : i32
    %c0_i32_0 = arith.constant 0 : i32
    %c0_i32_1 = arith.constant 0 : i32
    return %arg0, %c0_i32, %c0_i32_0 : i32, i32, i32
  }
}

</mosaic_0001>

<bundles_post_ra>
// kernel: edge_loss.1
= control target key start
LH: loop header
LB: loop body
LE: loop exit
PB: predicated region body
PF: predicated region fallthrough
CT: control target
= control target key end

     0   :  { %9 = vsyncpa [#allocation3], 0  ;;  %s1057_s0 = inlined_call_operand.hbm [shape: f32[6,16,16], index: 0, kind: input, shape index: {}]   ;;  %s1058_s1 = inlined_call_operand.hbm [shape: f32[6,16,16], index: 1, kind: input, shape index: {}]   ;;  %s1059_s2 = inlined_call_operand.hbm [shape: f32[16,16], index: 2, kind: input, shape index: {}]   ;;  %s1060_s3 = inlined_call_operand.vmem [shape: f32[16,16], index: 3, kind: input, shape index: {}]   ;;  %s1061_s4 = inlined_call_operand.vmem [shape: f32[6,8,128], index: 4, kind: output, shape index: {}]  }
   0x1   :  { %11 = vsyncpa [#allocation3 + $0x1], 0 }
   0x2   :  { %12 = vsyncpa [#allocation5], 0 }
   0x3   :  { %14 = vsyncpa [#allocation5 + $0x1], 0  ;;  %s852_s15 = smov 0   ;;  %s854_s16 = smov 0  }
   0x4   :  { %s856_s17 = smov 0   ;;  %s858_s18 = smov 0  }
   0x5 LB: > { %s871_s19 = sadd.s32 4294967295, %s820_s18   ;;  %p40_p0 = scmp.ne.s32.totalorder %s812_s16, %s808_s15  ;;  %s820_s18 = sphi %s858_s18, %s1076_s18   ;;  %s816_s17 = sphi %s856_s17, %s1075_s17   ;;  %s812_s16 = sphi %s854_s16, %s1074_s16   ;;  %s808_s15 = sphi %s852_s15, %s1073_s15  }
   0x6   : > { %p1062_p1 = scmp.eq.s32.totalorder %s871_s19, 0  ;;  %p575_p2 = scmp.ge.s32.totalorder %s820_s18, 1 }
   0x7   : > { %p145_p3 = scmp.lt.s32.totalorder %s820_s18, 7  ;;  %s822_s22 = smov [#allocation6]  }
   0x8   : > { %p879_p4 = por %p1062_p1, %p40_p0  ;;  %s157_s23 = sshll.u32 %s822_s22, 4  ;;  %s158_s23 = int_to_ptr.vmem [resolvable:$true] %s157_s23 }
   0x9   : > { %p883_p5 = pnand %p575_p2, %p145_p3  ;;  %s896_s25 = sadd.s32 1, %s820_s18  }
   0xa   : > { %s1065_s20 = scalar_select %p879_p4, 1, 0 }
   0xb   : > { %s1066_s21 = scalar_select %p883_p5, 1, 0 }
   0xc   : > { %p637_p6 = pneg %p883_p5  ;;  %s27_s26 = sadd.s32 1, %s816_s17 }
   0xd   : > { %s24_s27 = ssub.s32 %s820_s18, %s896_s25  ;;  %s690_s30 = scalar_lea.hbm %s1059_s2, 256 }
   0xe   : > { %p891_p7 = pnand %p637_p6, %p1062_p1  ;;  %p691_p8 = scmp.ne.s32.totalorder %s1059_s2, %s690_s30 }
   0xf   : > { %p697_p12 = scmp.lt.u32.totalorder %s690_s30, %s1059_s2 }
  0x10   : > { %p692_p9 = pneg %p891_p7 }
  0x12   : > { %p693_p10 = pnand %p692_p9, %p691_p8 }
  0x14   : > { %p694_p11 = pneg %p693_p10 }
  0x16   : > { %p699_p13 = pnand %p697_p12, %p694_p11 }
  0x18   : > { %702 = shalt.err (!%p699_p13)
}
  0x19   : > { %s703_s9 = scalar_lea.vmem %s158_s23, 256  ;;  %p711_p6 = scmp.lt.s32.totalorder %s158_s23, %s158_s23 }
  0x1a   : > { %p704_p0 = scmp.ne.s32.totalorder %s158_s23, %s703_s9  ;;  %p712_p1 = scmp.lt.s32.totalorder %s703_s9, %s703_s9 }
  0x1c   : > { %p706_p2 = pnand %p704_p0, %p692_p9  ;;  %p713_p4 = por %p712_p1, %p711_p6 }
  0x1e   : > { %p707_p3 = pneg %p706_p2 }
  0x20   : > { %p714_p5 = pnand %p713_p4, %p707_p3 }
  0x22   : > { %717 = shalt.err (!%p714_p5)
}
  0x23   : > { %s823_s10 = smov 128   ;;  %s824_s11 = smov 8  }
  0x24   : > { %640 = dma.hbm_to_vmem [thread:$0]  (!%p891_p7), %s1059_s2, 256, %s158_s23, [#allocation5], %s823_s10, %s823_s10, %s824_s11  }
  0x25   : > { %p25_p1 = scmp.eq.s32.totalorder %s24_s27, 0  ;;  %p34_p4 = scmp.ne.s32.totalorder %s816_s17, %s812_s16 }
  0x26   : > { %p35_p5 = scmp.eq.s32.totalorder %s820_s18, 0  ;;  %p649_p8 = scmp.lt.s32.totalorder %s820_s18, 6 }
  0x27   : > { %s925_s14 = scalar_select %p25_p1, %s816_s17, %s27_s26  }
  0x28   : > { %p36_p9 = por %p35_p5, %p34_p4  ;;  %s174_s15 = sand.u32 1, %s816_s17  }
  0x29   : > { %s578_s22 = sshll.u32 %s174_s15, 4  ;;  %s595_s28 = sshll.u32 %s820_s18, 8 }
  0x2a   : > { %s932_s24 = scalar_lea.hbm %s1057_s0, %s595_s28  ;;  %s178_s5 = scalar_lea.vmem [#allocation2], %s578_s22 }
  0x2b   : > { %s185_s23 = sshll.u32 %s178_s5, 4  ;;  %p936_p7 = pnand %p649_p8, %p36_p9  ;;  %s934_s23 = int_to_ptr.vmem [resolvable:$true] %s185_s23 }
  0x2c   : > { %s943_s7 = scalar_lea.hbm %s1058_s1, %s595_s28  ;;  %s199_s8 = scalar_lea.vmem [#allocation4], %s578_s22 }
  0x2d   : > { %s945_s9 = sshll.u32 %s199_s8, 4  ;;  %s947_s12 = scalar_lea.sflag [#allocation3], %s174_s15  ;;  %s979_s9 = int_to_ptr.vmem [resolvable:$true] %s945_s9 }
  0x2e   : > { %s718_s13 = scalar_lea.hbm %s932_s24, 256  ;;  %p720_p11 = pneg %p936_p7 }
  0x2f   : > { %p719_p10 = scmp.ne.s32.totalorder %s932_s24, %s718_s13  ;;  %s723_s5 = scalar_lea.hbm %s1057_s0, 1536 }
  0x30   : > { %p724_p0 = scmp.lt.u32.totalorder %s932_s24, %s1057_s0  ;;  %p725_p2 = scmp.lt.u32.totalorder %s723_s5, %s718_s13 }
  0x31   : > { %p721_p12 = pnand %p720_p11, %p719_p10  ;;  %p727_p6 = scmp.lt.u32.totalorder %s718_s13, %s932_s24 }
  0x32   : > { %p726_p3 = por %p725_p2, %p724_p0 }
  0x33   : > { %p722_p13 = pneg %p721_p12 }
  0x34   : > { %p728_p1 = por %p727_p6, %p726_p3 }
  0x36   : > { %p729_p4 = pnand %p728_p1, %p722_p13 }
  0x38   : > { %732 = shalt.err (!%p729_p4)
}
  0x39   : > { %s733_s15 = scalar_lea.vmem %s934_s23, 256  ;;  %s825_s22 = smov [#allocation2]  }
  0x3a   : > { %p734_p5 = scmp.ne.s32.totalorder %s934_s23, %s733_s15  ;;  %s738_s6 = sshll.u32 %s825_s22, 4  ;;  %s739_s6 = int_to_ptr.vmem [resolvable:$false] %s738_s6 }
  0x3b   : > { %s740_s8 = scalar_lea.vmem %s739_s6, 512  ;;  %p741_p10 = scmp.lt.s32.totalorder %s934_s23, %s739_s6 }
  0x3c   : > { %p736_p8 = pnand %p734_p5, %p720_p11  ;;  %p742_p12 = scmp.lt.s32.totalorder %s740_s8, %s733_s15 }
  0x3e   : > { %p737_p9 = pneg %p736_p8  ;;  %p743_p0 = por %p742_p12, %p741_p10 }
  0x40   : > { %p744_p2 = pnand %p743_p0, %p737_p9 }
  0x42   : > { %747 = shalt.err (!%p744_p2)
}
  0x43   : > { %644 = dma.hbm_to_vmem [thread:$0]  (!%p936_p7), %s932_s24, 256, %s934_s23, %s947_s12, %s823_s10, %s823_s10, %s824_s11  }
  0x44   : > { %s195_s13 = sand.u32 1, %s820_s18   ;;  %s748_s30 = scalar_lea.hbm %s943_s7, 256 }
  0x45   : > { %s982_s29 = scalar_lea.sflag [#allocation5], %s195_s13  ;;  %p749_p13 = scmp.ne.s32.totalorder %s943_s7, %s748_s30 }
  0x46   : > { %s753_s28 = scalar_lea.hbm %s1058_s1, 1536  ;;  %p754_p1 = scmp.lt.u32.totalorder %s943_s7, %s1058_s1 }
  0x47   : > { %p751_p3 = pnand %p749_p13, %p720_p11  ;;  %p755_p4 = scmp.lt.u32.totalorder %s753_s28, %s748_s30 }
  0x48   : > { %p757_p8 = scmp.lt.u32.totalorder %s748_s30, %s943_s7 }
  0x49   : > { %p752_p6 = pneg %p751_p3  ;;  %p756_p5 = por %p755_p4, %p754_p1 }
  0x4b   : > { %p758_p9 = por %p757_p8, %p756_p5 }
  0x4d   : > { %p759_p10 = pnand %p758_p9, %p752_p6 }
  0x4f   : > { %762 = shalt.err (!%p759_p10)
}
  0x50   : > { %s763_s18 = scalar_lea.vmem %s979_s9, 256  ;;  %s826_s24 = smov [#allocation4]  }
  0x51   : > { %p764_p12 = scmp.ne.s32.totalorder %s979_s9, %s763_s18  ;;  %s768_s23 = sshll.u32 %s826_s24, 4  ;;  %s769_s23 = int_to_ptr.vmem [resolvable:$false] %s768_s23 }
  0x52   : > { %s770_s12 = scalar_lea.vmem %s769_s23, 512  ;;  %p771_p13 = scmp.lt.s32.totalorder %s979_s9, %s769_s23 }
  0x53   : > { %p766_p0 = pnand %p764_p12, %p720_p11  ;;  %p772_p3 = scmp.lt.s32.totalorder %s770_s12, %s763_s18 }
  0x55   : > { %p767_p2 = pneg %p766_p0  ;;  %p773_p1 = por %p772_p3, %p771_p13 }
  0x57   : > { %p774_p4 = pnand %p773_p1, %p767_p2 }
  0x59   : > { %777 = shalt.err (!%p774_p4)
}
  0x5a   : > { %647 = dma.hbm_to_vmem [thread:$0]  (!%p936_p7), %s943_s7, 256, %s979_s9, %s982_s29, %s823_s10, %s823_s10, %s824_s11  }
  0x5b   : > { %p1069_p11 = scmp.ne.s32.totalorder %s1066_s21, 0 }
  0x5c   : > { %s220_s6 = sand.u32 (!%p1069_p11), 1, %s812_s16   ;;  %p1070_p6 = scmp.ne.s32.totalorder (!%p1069_p11), %s1065_s20, 0 }
  0x5d   : > { %218 = sbr.rel (%p1069_p11) target bundleno = 774 (0x306), region = 36  ;;  %s585_s8 = sshll.u32 (!%p1069_p11), %s220_s6, 4 }
  0x5e   : > { %s221_s13 = scalar_lea.sflag (!%p1069_p11), [#allocation3], %s220_s6  ;;  %s224_s30 = scalar_lea.vmem (!%p1069_p11), [#allocation2], %s585_s8 }
  0x64   : > { %795 = dma.done.wait (%p1070_p6), %s221_s13, 256  }
  0x65   : > { %797 = vsyncadd (%p1070_p6), %s221_s13, 4294967040  ;;  %s229_s26 = sand.u32 1, %s871_s19   ;;  %s233_s27 = scalar_lea.vmem [#allocation4], %s585_s8 }
  0x66   : > { %s230_s5 = scalar_lea.sflag [#allocation5], %s229_s26 }
  0x67   : > { %799 = dma.done.wait (%p1070_p6), %s230_s5, 256  }
  0x68   : > { %801 = vsyncadd (%p1070_p6), %s230_s5, 4294967040  ;;  %p1071_p7 = scmp.eq.s32.totalorder %s871_s19, 0 }
  0x6a   : > { %803 = dma.done.wait (%p1071_p7), [#allocation5], 256   ;;  %p1072_p5 = pmov %p1071_p7 }
  0x6b   : > { %vm278_vm0 = vcmask 130048   ;;  %v270_v0 = vld [vmem:[%s224_s30] sm:$0xff]  ;;  %v271_v1 = vld [vmem:[%s224_s30 + $0x8] sm:$0xff]  ;;  %p266_p8 = scmp.lt.s32.totalorder %s871_s19, 5 }
  0x6c   : > { %805 = vsyncadd (%p1072_p5), [#allocation5], 4294967040  ;;  %v272_v2 = vld [vmem:[%s233_s27] sm:$0xff]  ;;  %v273_v3 = vld [vmem:[%s233_s27 + $0x8] sm:$0xff] }
  0x6d   : > { %v274_v4 = vsub.f32 %v270_v0, %v272_v2  ;;  %v276_v5 = vld [vmem:[#allocation6] sm:$0xff]  ;;  %v275_v6 = vsub.f32 %v271_v1, %v273_v3  ;;  %v361_v8 = vld [vmem:[%s1060_s3 + $0x8] sm:$0xff]  ;;  %s1078_s19 = smov (!%p266_p8, %s871_s19), 5 }
  0x6e   : > { %609 = vmatprep.mubr.msk.f32.mxu0 %vm278_vm0, %v276_v5  ;;  %v360_v7 = vld [vmem:[%s1060_s3] sm:$0xff]  ;;  %v277_v11 = vld [vmem:[#allocation6 + $0x8] sm:$0xff]  ;;  %s588_s7 = sshll.u32 %s1078_s19, 3 }
  0x6f   : > { %v623_v9 = vpack.c.bf16 %v361_v8, %v360_v7  ;;  %v619_v10 = vpack.c.bf16 %v275_v6, %v274_v4  ;;  %s269_s28 = scalar_lea.vmem %s1061_s4, %s588_s7 }
  0x71   : > { %624 = vmatprep.subr.bf16.mxu1 %v623_v9  ;;  %620 = vmatprep.subr.bf16.mxu0 %v619_v10 }
  0x72   : > { %626 = vmatpush3.bf16.msra.mxu1 %v623_v9  ;;  %622 = vmatpush3.bf16.msra.mxu0 %v619_v10 }
  0x75   : > { %610 = vmatmul.mubr.msk.f32.vlgmr.msra.gmra.mrb[0].mxu0 %vm278_vm0, %v277_v11 }
 0x148   : > { %v611_v12 = vpop.f32.mrb[0].mxu0 }
 0x149   : > { %v351_v13 = vpop.f32.mrb[1].mxu0 }
 0x14a   : > { %616 = vmatprep.mubr.msk.f32.mxu1 %vm278_vm0, %v351_v13 }
 0x14b   : > { %617 = vmatmul.mubr.msk.f32.vlgmr.msra.gmra.mrb[0].mxu1 %vm278_vm0, %v611_v12 }
 0x21e   : > { %v618_v14 = vpop.f32.mrb[0].mxu1 }
 0x21f   : > { %v444_v15 = vsub.f32 %v275_v6, %v618_v14  ;;  %v434_v16 = vpop.f32.mrb[1].mxu1 }
 0x220   : > { %v443_v17 = vsub.f32 %v274_v4, %v434_v16 }
 0x221   : > { %v446_v18 = vmul.f32 %v444_v15, %v444_v15 }
 0x222   : > { %v445_v19 = vmul.f32 %v443_v17, %v443_v17 }
 0x223   : > { %v448_v20 = vadd.f32 1e-06, %v446_v18 }
 0x224   : > { %v447_v21 = vadd.f32 1e-06, %v445_v19 }
 0x225   : > { %686 = vrsqrt.f32 %v448_v20  ;;  %vm458_vm1 = vcmp.eq.f32.partialorder %v448_v20, inf  ;;  %v461_v26 = vand.u32 2147483648, %v448_v20  ;;  %vm460_vm3 = vcmp.eq.f32.partialorder %v448_v20, 0.0 }
 0x226   : > { %688 = vrsqrt.f32 %v447_v21  ;;  %vm451_vm2 = vcmp.eq.f32.partialorder %v447_v21, inf  ;;  %v454_v27 = vand.u32 2147483648, %v447_v21  ;;  %vm453_vm4 = vcmp.eq.f32.partialorder %v447_v21, 0.0 }
 0x22f   : > { %v687_v22 = vpop.eup %686 }
 0x230   : > { %v689_v23 = vpop.eup %688  ;;  %v457_v24 = vmul.f32 %v687_v22, %v448_v20 }
 0x231   : > { %v450_v25 = vmul.f32 %v689_v23, %v447_v21 }
 0x232   : > { %v459_v28 = vsel %vm458_vm1, %v448_v20, %v457_v24 }
 0x233   : > { %v452_v29 = vsel %vm451_vm2, %v447_v21, %v450_v25  ;;  %v462_v30 = vsel %vm460_vm3, %v461_v26, %v459_v28 }
 0x234   : > { %v455_v31 = vsel %vm453_vm4, %v454_v27, %v452_v29  ;;  %v464_v32 = vsel %vm278_vm0, %v462_v30, 0.0 }
 0x235   : > { %v463_v33 = vsel %vm278_vm0, %v455_v31, 0.0 }
 0x236   : > { %v465_v34 = vadd.f32 %v464_v32, %v463_v33 }
 0x238   : > { %466 = vadd.xlane.f32.xlu0 %v465_v34 }
 0x2c5   : > { %v467_v35 = vpop.xlane.xlu0 %466 }
 0x2c6   : > { %v468_v36 = vrot.slane %v467_v35, 4 }
 0x2c8   : > { %v469_v37 = vadd.f32 %v468_v36, %v467_v35 }
 0x2ca   : > { %v470_v38 = vrot.slane %v469_v37, 2 }
 0x2cc   : > { %v471_v39 = vadd.f32 %v470_v38, %v469_v37 }
 0x2ce   : > { %v472_v40 = vrot.slane %v471_v39, 1 }
 0x2d0   : > { %v473_v41 = vadd.f32 %v472_v40, %v471_v39 }
 0x2d2   : > { %627 = vpush %v473_v41 }
 0x303   : > { %s628_s15 = spop %627 }
 0x304   : > { %v475_v42 = vstv %s628_s15 }
 0x305   : > { %476 = vst [vmem:[%s269_s28] sm:$0xff] %v475_v42 }
 0x306 PF: > { %p17_p9 = scmp.ge.s32.totalorder %s896_s25, 8   ;;  %s1073_s15 = smov %s812_s16 }
 0x307   : > { %s1074_s16 = smov %s816_s17  ;;  %s1075_s17 = smov %s925_s14 }
 0x308   : > { %s1076_s18 = smov %s896_s25  ;;  %19 = sbr.rel (!%p17_p9) target bundleno = 5 (0x5), region = 93 }
 0x30f   :  { %496 = vsyncpa [#allocation3], 1 }
 0x310   :  { %498 = vsyncpa [#allocation3 + $0x1], 1 }
 0x311   :  { %499 = vsyncpa [#allocation5], 1 }
 0x312   :  { %501 = vsyncpa [#allocation5 + $0x1], 1 }

</bundles_post_ra>
